<compile_context>
chip_gen: v5e
topology: v5e:2x2
jax: 0.10.0
libtpu: 0.0.40
codegen_flags: <defaults>
</compile_context>

<pallas_src>
import functools

import jax
import jax.numpy as jnp
from jax.experimental import pallas as pl
from jax.experimental.pallas import tpu as pltpu

P = 128  # lane width every feature dim is padded to


def _round_up(n, m):
    return ((n + m - 1) // m) * m


def _cdiv(a, b):
    return -(-a // b)


def vae_kernel(xe_ref, w_sq_ref, w_d2_ref, w_d3_ref,
               b_sq_ref, b_d2_ref, b_d3_ref, out_ref, *, D, L):
    """xe_ref: [tm,128] bf16 (eps 0:L | x L:L+D | 0); out_ref: [tm,128] bf16."""
    xe = xe_ref[...]                       # bf16 slab (matmul operand)
    eps = xe.astype(jnp.float32)           # only lanes 0:L are meaningful

    def lin_sq(a_bf16, i):                 # [tm,128]bf16 @ [128,128]bf16 -> f32
        return (jnp.dot(a_bf16, w_sq_ref[i], preferred_element_type=jnp.float32)
                + b_sq_ref[i])

    # ---- encoder: Linear(D,128) -> ReLU -> Linear(128,64) -> ReLU ----
    h = jnp.maximum(lin_sq(xe, 0), 0.0)                    # enc1 (eps rows are zero-weighted)
    h = jnp.maximum(lin_sq(h.astype(jnp.bfloat16), 1), 0.0)  # enc2, hidden in lanes 0:64

    # ---- fused (mu | logvar) head: lanes 0:L = mu, L:2L = logvar, rest exactly 0 ----
    head = lin_sq(h.astype(jnp.bfloat16), 2)               # f32

    # ---- reparameterize: z = mu + eps * exp(0.5 * logvar) on lanes 0:L ----
    logvar_al = pltpu.roll(head, shift=P - L, axis=1)      # logvar -> lanes 0:L
    lane = jax.lax.broadcasted_iota(jnp.int32, head.shape, 1)
    z = jnp.where(lane < L, head + eps * jnp.exp(0.5 * logvar_al), 0.0)

    # ---- decoders (mean & logvar branches fused lane-wise) ----
    # first layers: dm1 -> lanes 0:64, dl1 -> lanes 64:128
    d = jnp.maximum(lin_sq(z.astype(jnp.bfloat16), 3), 0.0)
    # fused hidden2: one [128,256] dot -> dm_h2 lanes 0:128 | dl_h2 lanes 128:256
    t = jnp.maximum(
        jnp.dot(d.astype(jnp.bfloat16), w_d2_ref[...],
                preferred_element_type=jnp.float32) + b_d2_ref[...], 0.0)
    # fused output: one [256,128] dot -> recon_mu lanes 0:D | recon_logvar D:2D
    recon = (jnp.dot(t.astype(jnp.bfloat16), w_d3_ref[...],
                     preferred_element_type=jnp.float32) + b_d3_ref[...])

    # pack mu|logvar (head lanes 0:2L) into lanes 2D:2D+2L; single dense store
    out = recon + pltpu.roll(head, shift=2 * D, axis=1)
    out_ref[...] = out.astype(out_ref.dtype)


def init_params(key, input_dim, latent_dim):
    """nn.Linear-style init. Returns [(w[in,out], b[out])] in order:
    enc1, enc2, fc_mu, fc_logvar, dm1, dm2, dm3, dl1, dl2, dl3."""
    dims = [
        (input_dim, 128), (128, 64),                      # encoder
        (64, latent_dim), (64, latent_dim),               # fc_mu, fc_logvar
        (latent_dim, 64), (64, 128), (128, input_dim),    # decoder_mean
        (latent_dim, 64), (64, 128), (128, input_dim),    # decoder_logvar
    ]
    params = []
    for fan_in, fan_out in dims:
        key, kw, kb = jax.random.split(key, 3)
        bound = 1.0 / float(fan_in) ** 0.5
        w = jax.random.uniform(kw, (fan_in, fan_out), jnp.float32, -bound, bound)
        b = jax.random.uniform(kb, (fan_out,), jnp.float32, -bound, bound)
        params.append((w, b))
    return params


def pack_params(raw, input_dim, latent_dim):
    """Pack the 10 Linear layers into bf16 weights + f32 biases (fused layout)."""
    D, L = input_dim, latent_dim
    assert 2 * (D + L) <= P and 2 * L <= P and L + D <= P
    (e1, e2, mu_l, lv_l, dm1, dm2, dm3, dl1, dl2, dl3) = raw

    w_sq = jnp.zeros((4, P, P), jnp.float32)
    b_sq = jnp.zeros((4, 1, P), jnp.float32)
    w_sq = w_sq.at[0, L:L + D, :].set(e1[0]);       b_sq = b_sq.at[0, 0, :].set(e1[1])
    w_sq = w_sq.at[1, :, :64].set(e2[0]);           b_sq = b_sq.at[1, 0, :64].set(e2[1])
    w_sq = w_sq.at[2, :64, :L].set(mu_l[0]);        b_sq = b_sq.at[2, 0, :L].set(mu_l[1])
    w_sq = w_sq.at[2, :64, L:2 * L].set(lv_l[0]);   b_sq = b_sq.at[2, 0, L:2 * L].set(lv_l[1])
    w_sq = w_sq.at[3, :L, :64].set(dm1[0]);         b_sq = b_sq.at[3, 0, :64].set(dm1[1])
    w_sq = w_sq.at[3, :L, 64:].set(dl1[0]);         b_sq = b_sq.at[3, 0, 64:].set(dl1[1])

    w_d2 = jnp.zeros((P, 2 * P), jnp.float32)
    b_d2 = jnp.zeros((1, 2 * P), jnp.float32)
    w_d2 = w_d2.at[:64, :P].set(dm2[0]);            b_d2 = b_d2.at[0, :P].set(dm2[1])
    w_d2 = w_d2.at[64:, P:].set(dl2[0]);            b_d2 = b_d2.at[0, P:].set(dl2[1])

    w_d3 = jnp.zeros((2 * P, P), jnp.float32)
    b_d3 = jnp.zeros((1, P), jnp.float32)
    w_d3 = w_d3.at[:P, :D].set(dm3[0]);             b_d3 = b_d3.at[0, :D].set(dm3[1])
    w_d3 = w_d3.at[P:, D:2 * D].set(dl3[0]);        b_d3 = b_d3.at[0, D:2 * D].set(dl3[1])

    return (w_sq.astype(jnp.bfloat16), w_d2.astype(jnp.bfloat16),
            w_d3.astype(jnp.bfloat16), b_sq, b_d2, b_d3)


@jax.jit
def gaussian_vae_forward(x, eps, w_sq, w_d2, w_d3, b_sq, b_d2, b_d3):
    B, D = x.shape
    L = eps.shape[1]
    assert 2 * (D + L) <= P

    # Balanced batch tiling: big tiles (cap 1024) to amortize per-step overhead,
    # no >tm padding blowup, and an even tile count for large B so both v7x
    # TensorCores are fed through the "parallel" grid axis.
    TM_MAX = 1024
    n_tiles = _cdiv(B, TM_MAX)
    if B >= 512 and n_tiles % 2 == 1:
        n_tiles += 1
    tm = _round_up(_cdiv(B, n_tiles), 8)
    Bp = _round_up(B, tm)

    # One packed bf16 input slab: eps in lanes 0:L, x in lanes L:L+D, zeros else.
    xe = jnp.zeros((Bp, P), jnp.bfloat16)
    xe = xe.at[:B, :L].set(eps.astype(jnp.bfloat16))
    xe = xe.at[:B, L:L + D].set(x.astype(jnp.bfloat16))

    kern = functools.partial(vae_kernel, D=D, L=L)

    out = pl.pallas_call(
        kern,
        out_shape=jax.ShapeDtypeStruct((Bp, P), jnp.bfloat16),
        grid_spec=pltpu.PrefetchScalarGridSpec(
            num_scalar_prefetch=0,
            grid=(Bp // tm,),
            in_specs=[
                pl.BlockSpec((tm, P), lambda i: (i, 0)),          # packed x|eps slab
                pl.BlockSpec((4, P, P), lambda i: (0, 0, 0)),     # square weights (bf16)
                pl.BlockSpec((P, 2 * P), lambda i: (0, 0)),       # fused dec hidden2 W
                pl.BlockSpec((2 * P, P), lambda i: (0, 0)),       # fused dec output W
                pl.BlockSpec((4, 1, P), lambda i: (0, 0, 0)),     # square biases (f32)
                pl.BlockSpec((1, 2 * P), lambda i: (0, 0)),       # fused hidden2 bias
                pl.BlockSpec((1, P), lambda i: (0, 0)),           # fused output bias
            ],
            out_specs=pl.BlockSpec((tm, P), lambda i: (i, 0)),    # packed output slab
        ),
        compiler_params=pltpu.CompilerParams(
            dimension_semantics=("parallel",)),
    )(xe, w_sq, w_d2, w_d3, b_sq, b_d2, b_d3)
    # Weight/bias operands are grid-invariant (constant index_map), so their DMA
    # is only issued once; double-buffer VMEM cost is < 1 MiB and not binding.

    out = out.astype(jnp.float32)
    recon_mu = out[:B, 0:D]
    recon_logvar = out[:B, D:2 * D]
    mu = out[:B, 2 * D:2 * D + L]
    logvar = out[:B, 2 * D + L:2 * D + 2 * L]
    return recon_mu, recon_logvar, mu, logvar


def vae_reference(x, eps, raw):
    """Pure-JAX f32 reference matching the PyTorch module."""
    (e1, e2, mu_l, lv_l, dm1, dm2, dm3, dl1, dl2, dl3) = raw
    relu = jax.nn.relu
    lin = lambda a, p: a @ p[0] + p[1]
    h = relu(lin(x, e1))
    h = relu(lin(h, e2))
    mu = lin(h, mu_l)
    logvar = lin(h, lv_l)
    z = mu + eps * jnp.exp(0.5 * logvar)
    dm = relu(lin(z, dm1)); dm = relu(lin(dm, dm2)); recon_mu = lin(dm, dm3)
    dl = relu(lin(z, dl1)); dl = relu(lin(dl, dl2)); recon_lv = lin(dl, dl3)
    return recon_mu, recon_lv, mu, logvar


if __name__ == "__main__":
    INPUT_DIM = 16   # gen_obj.dim (synthetic)
    LATENT_DIM = 8   # gen_obj.latent_dim (synthetic)
    BATCH = 64

    key = jax.random.PRNGKey(0)
    kx, keps, kparams = jax.random.split(key, 3)

    x = jax.random.normal(kx, (BATCH, INPUT_DIM), jnp.float32)
    # TODO(synk): torch.randn_like draws eps inside forward(); here it is passed
    # in explicitly (deterministic) — could be moved in-kernel via pltpu.prng_*.
    eps = jax.random.normal(keps, (BATCH, LATENT_DIM), jnp.float32)

    raw_params = init_params(kparams, INPUT_DIM, LATENT_DIM)
    packed = pack_params(raw_params, INPUT_DIM, LATENT_DIM)

    outs = jax.block_until_ready(gaussian_vae_forward(x, eps, *packed))

    ref = vae_reference(x, eps, raw_params)
    # bf16 matmuls / bf16 I/O slabs -> loosened tolerance vs the f32 reference.
    for got, want in zip(outs, ref):
        assert got.shape == want.shape, (got.shape, want.shape)
        assert jnp.allclose(got, want, atol=5e-2, rtol=5e-2), "mismatch vs reference"

    print("KERNEL_OK")
</pallas_src>

<mosaic_0001>
module attributes {stable_mosaic.version = 11 : i64} {
  func.func @vae_kernel(%arg0: i32, %arg1: memref<64x128xbf16, #tpu.memory_space<vmem>>, %arg2: memref<4x128x128xbf16, #tpu.memory_space<vmem>>, %arg3: memref<128x256xbf16, #tpu.memory_space<vmem>>, %arg4: memref<256x128xbf16, #tpu.memory_space<vmem>>, %arg5: memref<4x1x128xf32, #tpu.memory_space<vmem>>, %arg6: memref<1x256xf32, #tpu.memory_space<vmem>>, %arg7: memref<1x128xf32, #tpu.memory_space<vmem>>, %arg8: memref<64x128xbf16, #tpu.memory_space<vmem>>) attributes {dimension_semantics = [#tpu.dimension_semantics<parallel>], iteration_bounds = array<i64: 1>, scalar_prefetch = 0 : i64, scratch_operands = 0 : i64, tpu.core_type = #tpu.core_type<tc>, window_params = [{transform_indices = @transform_0, window_bounds = array<i64: 64, 128>}, {pipeline_mode = #tpu.pipeline_mode<synchronous>, transform_indices = @transform_1, window_bounds = array<i64: 4, 128, 128>}, {pipeline_mode = #tpu.pipeline_mode<synchronous>, transform_indices = @transform_2, window_bounds = array<i64: 128, 256>}, {pipeline_mode = #tpu.pipeline_mode<synchronous>, transform_indices = @transform_3, window_bounds = array<i64: 256, 128>}, {pipeline_mode = #tpu.pipeline_mode<synchronous>, transform_indices = @transform_4, window_bounds = array<i64: 4, 1, 128>}, {pipeline_mode = #tpu.pipeline_mode<synchronous>, transform_indices = @transform_5, window_bounds = array<i64: 1, 256>}, {pipeline_mode = #tpu.pipeline_mode<synchronous>, transform_indices = @transform_6, window_bounds = array<i64: 1, 128>}, {transform_indices = @transform_7, window_bounds = array<i64: 64, 128>}]} {
    %c0 = arith.constant 0 : index
    %c0_0 = arith.constant 0 : index
    %0 = vector.load %arg1[%c0, %c0_0] : memref<64x128xbf16, #tpu.memory_space<vmem>>, vector<64x128xbf16>
    %1 = arith.extf %0 : vector<64x128xbf16> to vector<64x128xf32>
    %c0_1 = arith.constant 0 : index
    %c0_2 = arith.constant 0 : index
    %c0_3 = arith.constant 0 : index
    %2 = vector.load %arg2[%c0_1, %c0_2, %c0_3] : memref<4x128x128xbf16, #tpu.memory_space<vmem>>, vector<1x128x128xbf16>
    %3 = vector.shape_cast %2 : vector<1x128x128xbf16> to vector<128x128xbf16>
    %cst = arith.constant dense<0.000000e+00> : vector<64x128xf32>
    %4 = tpu.matmul %0, %3, %cst {dimension_numbers = #tpu.dot_dimension_numbers<[1], [0], [0], [1], [0, 0, 1, 1], [], []>} : vector<64x128xbf16>, vector<128x128xbf16>, vector<64x128xf32> -> vector<64x128xf32>
    %c0_4 = arith.constant 0 : index
    %c0_5 = arith.constant 0 : index
    %c0_6 = arith.constant 0 : index
    %5 = vector.load %arg5[%c0_4, %c0_5, %c0_6] : memref<4x1x128xf32, #tpu.memory_space<vmem>>, vector<1x1x128xf32>
    %6 = vector.shape_cast %5 : vector<1x1x128xf32> to vector<1x128xf32>
    %7 = vector.broadcast %6 : vector<1x128xf32> to vector<64x128xf32>
    %8 = arith.addf %4, %7 : vector<64x128xf32>
    %cst_7 = arith.constant 0.000000e+00 : f32
    %9 = vector.broadcast %cst_7 : f32 to vector<64x128xf32>
    %10 = arith.maximumf %8, %9 : vector<64x128xf32>
    %11 = arith.truncf %10 : vector<64x128xf32> to vector<64x128xbf16>
    %c1 = arith.constant 1 : index
    %c0_8 = arith.constant 0 : index
    %c0_9 = arith.constant 0 : index
    %12 = vector.load %arg2[%c1, %c0_8, %c0_9] : memref<4x128x128xbf16, #tpu.memory_space<vmem>>, vector<1x128x128xbf16>
    %13 = vector.shape_cast %12 : vector<1x128x128xbf16> to vector<128x128xbf16>
    %cst_10 = arith.constant dense<0.000000e+00> : vector<64x128xf32>
    %14 = tpu.matmul %11, %13, %cst_10 {dimension_numbers = #tpu.dot_dimension_numbers<[1], [0], [0], [1], [0, 0, 1, 1], [], []>} : vector<64x128xbf16>, vector<128x128xbf16>, vector<64x128xf32> -> vector<64x128xf32>
    %c1_11 = arith.constant 1 : index
    %c0_12 = arith.constant 0 : index
    %c0_13 = arith.constant 0 : index
    %15 = vector.load %arg5[%c1_11, %c0_12, %c0_13] : memref<4x1x128xf32, #tpu.memory_space<vmem>>, vector<1x1x128xf32>
    %16 = vector.shape_cast %15 : vector<1x1x128xf32> to vector<1x128xf32>
    %17 = vector.broadcast %16 : vector<1x128xf32> to vector<64x128xf32>
    %18 = arith.addf %14, %17 : vector<64x128xf32>
    %cst_14 = arith.constant 0.000000e+00 : f32
    %19 = vector.broadcast %cst_14 : f32 to vector<64x128xf32>
    %20 = arith.maximumf %18, %19 : vector<64x128xf32>
    %21 = arith.truncf %20 : vector<64x128xf32> to vector<64x128xbf16>
    %c2 = arith.constant 2 : index
    %c0_15 = arith.constant 0 : index
    %c0_16 = arith.constant 0 : index
    %22 = vector.load %arg2[%c2, %c0_15, %c0_16] : memref<4x128x128xbf16, #tpu.memory_space<vmem>>, vector<1x128x128xbf16>
    %23 = vector.shape_cast %22 : vector<1x128x128xbf16> to vector<128x128xbf16>
    %cst_17 = arith.constant dense<0.000000e+00> : vector<64x128xf32>
    %24 = tpu.matmul %21, %23, %cst_17 {dimension_numbers = #tpu.dot_dimension_numbers<[1], [0], [0], [1], [0, 0, 1, 1], [], []>} : vector<64x128xbf16>, vector<128x128xbf16>, vector<64x128xf32> -> vector<64x128xf32>
    %c2_18 = arith.constant 2 : index
    %c0_19 = arith.constant 0 : index
    %c0_20 = arith.constant 0 : index
    %25 = vector.load %arg5[%c2_18, %c0_19, %c0_20] : memref<4x1x128xf32, #tpu.memory_space<vmem>>, vector<1x1x128xf32>
    %26 = vector.shape_cast %25 : vector<1x1x128xf32> to vector<1x128xf32>
    %27 = vector.broadcast %26 : vector<1x128xf32> to vector<64x128xf32>
    %28 = arith.addf %24, %27 : vector<64x128xf32>
    %c120_i32 = arith.constant 120 : i32
    %29 = tpu.dynamic_rotate %28 by %c120_i32 dim 1 : vector<64x128xf32>, i32 -> vector<64x128xf32>
    %30 = tpu.iota {dimensions = array<i32: 1>} : vector<64x128xi32>
    %c8_i32 = arith.constant 8 : i32
    %31 = vector.broadcast %c8_i32 : i32 to vector<64x128xi32>
    %32 = arith.cmpi slt, %30, %31 : vector<64x128xi32>
    %cst_21 = arith.constant 5.000000e-01 : f32
    %33 = vector.broadcast %cst_21 : f32 to vector<64x128xf32>
    %34 = arith.mulf %33, %29 : vector<64x128xf32>
    %35 = math.exp %34 : vector<64x128xf32>
    %36 = arith.mulf %1, %35 : vector<64x128xf32>
    %37 = arith.addf %28, %36 : vector<64x128xf32>
    %cst_22 = arith.constant 0.000000e+00 : f32
    %38 = vector.broadcast %cst_22 : f32 to vector<64x128xf32>
    %39 = arith.select %32, %37, %38 : vector<64x128xi1>, vector<64x128xf32>
    %40 = arith.truncf %39 : vector<64x128xf32> to vector<64x128xbf16>
    %c3 = arith.constant 3 : index
    %c0_23 = arith.constant 0 : index
    %c0_24 = arith.constant 0 : index
    %41 = vector.load %arg2[%c3, %c0_23, %c0_24] : memref<4x128x128xbf16, #tpu.memory_space<vmem>>, vector<1x128x128xbf16>
    %42 = vector.shape_cast %41 : vector<1x128x128xbf16> to vector<128x128xbf16>
    %cst_25 = arith.constant dense<0.000000e+00> : vector<64x128xf32>
    %43 = tpu.matmul %40, %42, %cst_25 {dimension_numbers = #tpu.dot_dimension_numbers<[1], [0], [0], [1], [0, 0, 1, 1], [], []>} : vector<64x128xbf16>, vector<128x128xbf16>, vector<64x128xf32> -> vector<64x128xf32>
    %c3_26 = arith.constant 3 : index
    %c0_27 = arith.constant 0 : index
    %c0_28 = arith.constant 0 : index
    %44 = vector.load %arg5[%c3_26, %c0_27, %c0_28] : memref<4x1x128xf32, #tpu.memory_space<vmem>>, vector<1x1x128xf32>
    %45 = vector.shape_cast %44 : vector<1x1x128xf32> to vector<1x128xf32>
    %46 = vector.broadcast %45 : vector<1x128xf32> to vector<64x128xf32>
    %47 = arith.addf %43, %46 : vector<64x128xf32>
    %cst_29 = arith.constant 0.000000e+00 : f32
    %48 = vector.broadcast %cst_29 : f32 to vector<64x128xf32>
    %49 = arith.maximumf %47, %48 : vector<64x128xf32>
    %50 = arith.truncf %49 : vector<64x128xf32> to vector<64x128xbf16>
    %c0_30 = arith.constant 0 : index
    %c0_31 = arith.constant 0 : index
    %51 = vector.load %arg3[%c0_30, %c0_31] : memref<128x256xbf16, #tpu.memory_space<vmem>>, vector<128x256xbf16>
    %cst_32 = arith.constant dense<0.000000e+00> : vector<64x256xf32>
    %52 = tpu.matmul %50, %51, %cst_32 {dimension_numbers = #tpu.dot_dimension_numbers<[1], [0], [0], [1], [0, 0, 1, 1], [], []>} : vector<64x128xbf16>, vector<128x256xbf16>, vector<64x256xf32> -> vector<64x256xf32>
    %c0_33 = arith.constant 0 : index
    %c0_34 = arith.constant 0 : index
    %53 = vector.load %arg6[%c0_33, %c0_34] : memref<1x256xf32, #tpu.memory_space<vmem>>, vector<1x256xf32>
    %54 = vector.broadcast %53 : vector<1x256xf32> to vector<64x256xf32>
    %55 = arith.addf %52, %54 : vector<64x256xf32>
    %cst_35 = arith.constant 0.000000e+00 : f32
    %56 = vector.broadcast %cst_35 : f32 to vector<64x256xf32>
    %57 = arith.maximumf %55, %56 : vector<64x256xf32>
    %58 = arith.truncf %57 : vector<64x256xf32> to vector<64x256xbf16>
    %c0_36 = arith.constant 0 : index
    %c0_37 = arith.constant 0 : index
    %59 = vector.load %arg4[%c0_36, %c0_37] : memref<256x128xbf16, #tpu.memory_space<vmem>>, vector<256x128xbf16>
    %cst_38 = arith.constant dense<0.000000e+00> : vector<64x128xf32>
    %60 = tpu.matmul %58, %59, %cst_38 {dimension_numbers = #tpu.dot_dimension_numbers<[1], [0], [0], [1], [0, 0, 1, 1], [], []>} : vector<64x256xbf16>, vector<256x128xbf16>, vector<64x128xf32> -> vector<64x128xf32>
    %c0_39 = arith.constant 0 : index
    %c0_40 = arith.constant 0 : index
    %61 = vector.load %arg7[%c0_39, %c0_40] : memref<1x128xf32, #tpu.memory_space<vmem>>, vector<1x128xf32>
    %62 = vector.broadcast %61 : vector<1x128xf32> to vector<64x128xf32>
    %63 = arith.addf %60, %62 : vector<64x128xf32>
    %c32_i32 = arith.constant 32 : i32
    %64 = tpu.dynamic_rotate %28 by %c32_i32 dim 1 : vector<64x128xf32>, i32 -> vector<64x128xf32>
    %65 = arith.addf %63, %64 : vector<64x128xf32>
    %66 = arith.truncf %65 : vector<64x128xf32> to vector<64x128xbf16>
    %c0_41 = arith.constant 0 : index
    %c0_42 = arith.constant 0 : index
    %67 = vector.load %arg8[%c0_41, %c0_42] : memref<64x128xbf16, #tpu.memory_space<vmem>>, vector<64x128xbf16>
    tpu.vector_store %arg8[%c0_41, %c0_42], %66 {strides = array<i32>} : memref<64x128xbf16, #tpu.memory_space<vmem>>, vector<64x128xbf16>,
    return
  }
  func.func @transform_0(%arg0: i32) -> (i32, i32) {
    %c0_i32 = arith.constant 0 : i32
    %c0_i32_0 = arith.constant 0 : i32
    return %arg0, %c0_i32 : i32, i32
  }
  func.func @transform_1(%arg0: i32) -> (i32, i32, i32) {
    %c0_i32 = arith.constant 0 : i32
    %c0_i32_0 = arith.constant 0 : i32
    %c0_i32_1 = arith.constant 0 : i32
    %c0_i32_2 = arith.constant 0 : i32
    return %c0_i32, %c0_i32_0, %c0_i32_1 : i32, i32, i32
  }
  func.func @transform_2(%arg0: i32) -> (i32, i32) {
    %c0_i32 = arith.constant 0 : i32
    %c0_i32_0 = arith.constant 0 : i32
    %c0_i32_1 = arith.constant 0 : i32
    return %c0_i32, %c0_i32_0 : i32, i32
  }
  func.func @transform_3(%arg0: i32) -> (i32, i32) {
    %c0_i32 = arith.constant 0 : i32
    %c0_i32_0 = arith.constant 0 : i32
    %c0_i32_1 = arith.constant 0 : i32
    return %c0_i32, %c0_i32_0 : i32, i32
  }
  func.func @transform_4(%arg0: i32) -> (i32, i32, i32) {
    %c0_i32 = arith.constant 0 : i32
    %c0_i32_0 = arith.constant 0 : i32
    %c0_i32_1 = arith.constant 0 : i32
    %c0_i32_2 = arith.constant 0 : i32
    return %c0_i32, %c0_i32_0, %c0_i32_1 : i32, i32, i32
  }
  func.func @transform_5(%arg0: i32) -> (i32, i32) {
    %c0_i32 = arith.constant 0 : i32
    %c0_i32_0 = arith.constant 0 : i32
    %c0_i32_1 = arith.constant 0 : i32
    return %c0_i32, %c0_i32_0 : i32, i32
  }
  func.func @transform_6(%arg0: i32) -> (i32, i32) {
    %c0_i32 = arith.constant 0 : i32
    %c0_i32_0 = arith.constant 0 : i32
    %c0_i32_1 = arith.constant 0 : i32
    return %c0_i32, %c0_i32_0 : i32, i32
  }
  func.func @transform_7(%arg0: i32) -> (i32, i32) {
    %c0_i32 = arith.constant 0 : i32
    %c0_i32_0 = arith.constant 0 : i32
    return %arg0, %c0_i32 : i32, i32
  }
}

</mosaic_0001>

<bundles_post_ra>
// kernel: gaussian_vae_forward.1
= control target key start
LH: loop header
LB: loop body
LE: loop exit
PB: predicated region body
PF: predicated region fallthrough
CT: control target
= control target key end

     0   :  { %12 = vsyncpa [#allocation3], 0  ;;  %s1432_s27 = smov [#allocation2]   ;;  %s1433_s29 = smov 64   ;;  %s1730_s0 = inlined_call_operand.vmem [shape: bf16[64,128], index: 0, kind: input, shape index: {}]   ;;  %s1731_s1 = inlined_call_operand.hbm [shape: bf16[4,128,128], index: 1, kind: input, shape index: {}]   ;;  %s1732_s2 = inlined_call_operand.vmem [shape: bf16[128,256], index: 2, kind: input, shape index: {}]   ;;  %s1733_s3 = inlined_call_operand.vmem [shape: bf16[256,128], index: 3, kind: input, shape index: {}]   ;;  %s1734_s4 = inlined_call_operand.vmem [shape: f32[4,1,128], index: 4, kind: input, shape index: {}]   ;;  %s1735_s5 = inlined_call_operand.vmem [shape: f32[1,256], index: 5, kind: input, shape index: {}]   ;;  %s1736_s6 = inlined_call_operand.vmem [shape: f32[1,128], index: 6, kind: input, shape index: {}]   ;;  %s1737_s7 = inlined_call_operand.vmem [shape: bf16[64,128], index: 7, kind: output, shape index: {}]  }
   0x1   :  { %s19_s26 = sshll.u32 %s1731_s1, 4  ;;  %s21_s28 = sshll.u32 %s1432_s27, 4  ;;  %s20_s26 = int_to_ptr.hbm [resolvable:$true] %s19_s26  ;;  %s22_s28 = int_to_ptr.vmem [resolvable:$true] %s21_s28 }
   0x2   :  { %s1434_s30 = smov 4  }
   0x3   :  { %27 = dma.hbm_to_vmem [thread:$0]  %s20_s26, 4096, %s22_s28, [#allocation3], %s1433_s29, %s1433_s29, %s1434_s30  }
   0x4   :  { %1430 = dma.done.wait [#allocation3], 4096  }
   0x5   :  { %1431 = vsyncadd [#allocation3], 4294963200  ;;  %v1300_v0 = vld [vmem:[#allocation2 + $0x38] sm:$0xff]  ;;  %v1299_v1 = vld [vmem:[#allocation2 + $0x30] sm:$0xff]  ;;  %s1435_s21 = smov 120   ;;  %s1436_s22 = smov 32  }
   0x6   :  { %150 = vmatpush.bf16.msra.mxu0 %v1300_v0  ;;  %v1298_v2 = vld [vmem:[#allocation2 + $0x28] sm:$0xff]  ;;  %v1297_v3 = vld [vmem:[#allocation2 + $0x20] sm:$0xff]  ;;  %v1296_v4 = vld [vmem:[#allocation2 + $0x18] sm:$0xff] }
   0x7   :  { %v1295_v5 = vld [vmem:[#allocation2 + $0x10] sm:$0xff]  ;;  %v1294_v6 = vld [vmem:[#allocation2 + $0x8] sm:$0xff]  ;;  %v1293_v7 = vld [vmem:[#allocation2] sm:$0xff] }
   0x8   :  { %v1289_v8 = vld [vmem:[%s1730_s0] sm:$0xff]  ;;  %v1290_v9 = vld [vmem:[%s1730_s0 + $0x8] sm:$0xff]  ;;  %v1308_v10 = vld [vmem:[#allocation2 + $0x78] sm:$0xff] }
   0x9   :  { %261 = vmatpush.bf16.msra.mxu1 %v1308_v10  ;;  %v1307_v11 = vld [vmem:[#allocation2 + $0x70] sm:$0xff]  ;;  %v1306_v12 = vld [vmem:[#allocation2 + $0x68] sm:$0xff]  ;;  %v1305_v13 = vld [vmem:[#allocation2 + $0x60] sm:$0xff] }
   0xa   :  { %151 = vmatpush.bf16.msra.mxu0 %v1299_v1  ;;  %v1291_v14 = vld [vmem:[%s1730_s0 + $0x10] sm:$0xff]  ;;  %v1292_v15 = vld [vmem:[%s1730_s0 + $0x18] sm:$0xff]  ;;  %v1302_v18 = vld [vmem:[#allocation2 + $0x48] sm:$0xff] }
   0xb   :  { %v1304_v16 = vld [vmem:[#allocation2 + $0x58] sm:$0xff]  ;;  %v1303_v17 = vld [vmem:[#allocation2 + $0x50] sm:$0xff]  ;;  %v1301_v19 = vld [vmem:[#allocation2 + $0x40] sm:$0xff] }
   0xc   :  { %v1385_v21 = vld [vmem:[%s1734_s4] ss:$0 sm:$0xff]  ;;  %v1316_v35 = vld [vmem:[#allocation2 + $0xb8] sm:$0xff]  ;;  %v1315_v37 = vld [vmem:[#allocation2 + $0xb0] sm:$0xff] }
   0xd   :  { %262 = vmatpush.bf16.msra.mxu1 %v1307_v11  ;;  %372 = vmatpush.bf16.msra.mxu2 %v1316_v35  ;;  %v1314_v38 = vld [vmem:[#allocation2 + $0xa8] sm:$0xff]  ;;  %v1313_v42 = vld [vmem:[#allocation2 + $0xa0] sm:$0xff]  ;;  %v1312_v53 = vld [vmem:[#allocation2 + $0x98] sm:$0xff] }
   0xe   :  { %152 = vmatpush.bf16.msra.mxu0 %v1298_v2  ;;  %v1311_v54 = vld [vmem:[#allocation2 + $0x90] sm:$0xff]  ;;  %v1310_v55 = vld [vmem:[#allocation2 + $0x88] sm:$0xff]  ;;  %v1309_v56 = vld [vmem:[#allocation2 + $0x80] sm:$0xff] }
   0xf   :  { %v1386_v58 = vld [vmem:[%s1734_s4 + $0x1] ss:$0 sm:$0xff]  ;;  %v1324_v35 = vld [vmem:[#allocation2 + $0xf8] sm:$0xff] }
  0x10   :  { %542 = vmatpush.bf16.msra.mxu3 %v1324_v35 }
  0x11   :  { %263 = vmatpush.bf16.msra.mxu1 %v1306_v12  ;;  %373 = vmatpush.bf16.msra.mxu2 %v1315_v37 }
  0x12   :  { %153 = vmatpush.bf16.msra.mxu0 %v1297_v3 }
  0x15   :  { %264 = vmatpush.bf16.msra.mxu1 %v1305_v13  ;;  %374 = vmatpush.bf16.msra.mxu2 %v1314_v38 }
  0x16   :  { %154 = vmatpush.bf16.msra.mxu0 %v1296_v4 }
  0x19   :  { %265 = vmatpush.bf16.msra.mxu1 %v1304_v16  ;;  %375 = vmatpush.bf16.msra.mxu2 %v1313_v42  ;;  %v1321_v42 = vld [vmem:[#allocation2 + $0xe0] sm:$0xff] }
  0x1a   :  { %155 = vmatpush.bf16.msra.mxu0 %v1295_v5 }
  0x1d   :  { %266 = vmatpush.bf16.msra.mxu1 %v1303_v17  ;;  %376 = vmatpush.bf16.msra.mxu2 %v1312_v53  ;;  %v42_v53 = vld [vmem:[%s1730_s0] sm:$0xff]  }
  0x1e   :  { %156 = vmatpush.bf16.msra.mxu0 %v1294_v6 }
  0x21   :  { %267 = vmatpush.bf16.msra.mxu1 %v1302_v18  ;;  %377 = vmatpush.bf16.msra.mxu2 %v1311_v54  ;;  %v417_v54 = vlaneseq }
  0x22   :  { %157 = vmatpush.bf16.msra.mxu0 %v1293_v7 }
  0x25   :  { %158 = vmatmul.bf16.vlgmr.msra.gmra.mxu0 %v1289_v8  ;;  %268 = vmatpush.bf16.msra.mxu1 %v1301_v19 }
  0x26   :  { %378 = vmatpush.bf16.msra.mxu2 %v1310_v55  ;;  %v50_v55 = vunpack.c.l.bf16 %v42_v53 }
  0x2a   :  { %379 = vmatpush.bf16.msra.mxu2 %v1309_v56 }
  0x35   :  { %163 = vmatmul.bf16.gmra.mxu0 %v1290_v9 }
  0x45   :  { %168 = vmatmul.bf16.gmra.mxu0 %v1291_v14 }
  0x55   :  { %173 = vmatmul.bf16.gmra.mxu0 %v1292_v15 }
  0xa2   :  { %v159_v20 = vpop.f32.mrf.mxu0 }
  0xa3   :  { %v160_v22 = vadd.f32 %v1385_v21, %v159_v20 }
  0xa5   :  { %v179_v25 = vmax.f32 %v160_v22, 0.0  ;;  %v1387_v22 = vld [vmem:[%s1734_s4 + $0x2] ss:$0 sm:$0xff] }
  0xaa   :  { %v161_v23 = vpop.f32.mrf.mxu0 }
  0xab   :  { %v162_v24 = vadd.f32 %v1385_v21, %v161_v23 }
  0xad   :  { %v180_v26 = vmax.f32 %v162_v24, 0.0 }
  0xaf   :  { %v187_v27 = vpack.c.bf16 %v180_v26, %v179_v25 }
  0xb1   :  { %269 = vmatmul.bf16.vlgmr.msra.gmra.mxu1 %v187_v27 }
  0xb2   :  { %v164_v28 = vpop.f32.mrf.mxu0 }
  0xb3   :  { %v165_v29 = vadd.f32 %v1385_v21, %v164_v28 }
  0xb5   :  { %v181_v32 = vmax.f32 %v165_v29, 0.0 }
  0xba   :  { %v166_v30 = vpop.f32.mrf.mxu0 }
  0xbb   :  { %v167_v31 = vadd.f32 %v1385_v21, %v166_v30 }
  0xbd   :  { %v182_v33 = vmax.f32 %v167_v31, 0.0 }
  0xbf   :  { %v188_v34 = vpack.c.bf16 %v182_v33, %v181_v32 }
  0xc1   :  { %274 = vmatmul.bf16.gmra.mxu1 %v188_v34 }
  0xc2   :  { %v169_v36 = vpop.f32.mrf.mxu0 }
  0xc3   :  { %v170_v39 = vadd.f32 %v1385_v21, %v169_v36  ;;  %v1323_v36 = vld [vmem:[#allocation2 + $0xf0] sm:$0xff] }
  0xc4   :  { %543 = vmatpush.bf16.msra.mxu3 %v1323_v36  ;;  %v1337_v36 = vld [vmem:[%s1732_s2 + $0x64] sm:$0xf] }
  0xc5   :  { %v183_v43 = vmax.f32 %v170_v39, 0.0 }
  0xca   :  { %v171_v40 = vpop.f32.mrf.mxu0 }
  0xcb   :  { %v172_v41 = vadd.f32 %v1385_v21, %v171_v40 }
  0xcd   :  { %v184_v44 = vmax.f32 %v172_v41, 0.0  ;;  %v1322_v41 = vld [vmem:[#allocation2 + $0xe8] sm:$0xff] }
  0xce   :  { %544 = vmatpush.bf16.msra.mxu3 %v1322_v41 }
  0xcf   :  { %v189_v45 = vpack.c.bf16 %v184_v44, %v183_v43  ;;  %v1320_v43 = vld [vmem:[#allocation2 + $0xd8] sm:$0xff]  ;;  %v1319_v44 = vld [vmem:[#allocation2 + $0xd0] sm:$0xff] }
  0xd1   :  { %279 = vmatmul.bf16.gmra.mxu1 %v189_v45  ;;  %v1318_v45 = vld [vmem:[#allocation2 + $0xc8] sm:$0xff] }
  0xd2   :  { %v174_v46 = vpop.f32.mrf.mxu0  ;;  %545 = vmatpush.bf16.msra.mxu3 %v1321_v42 }
  0xd3   :  { %v175_v47 = vadd.f32 %v1385_v21, %v174_v46  ;;  %v1317_v46 = vld [vmem:[#allocation2 + $0xc0] sm:$0xff] }
  0xd5   :  { %v185_v50 = vmax.f32 %v175_v47, 0.0 }
  0xd6   :  { %546 = vmatpush.bf16.msra.mxu3 %v1320_v43 }
  0xda   :  { %v176_v48 = vpop.f32.mrf.mxu0  ;;  %547 = vmatpush.bf16.msra.mxu3 %v1319_v44  ;;  %v1203_v44 = vld [vmem:[%s1732_s2 + $0x50] sm:$0xf] }
  0xdb   :  { %v177_v49 = vadd.f32 %v1385_v21, %v176_v48 }
  0xdd   :  { %v186_v51 = vmax.f32 %v177_v49, 0.0 }
  0xde   :  { %548 = vmatpush.bf16.msra.mxu3 %v1318_v45  ;;  %v1336_v45 = vld [vmem:[%s1732_s2 + $0x54] sm:$0xf0] }
  0xdf   :  { %v190_v52 = vpack.c.bf16 %v186_v51, %v185_v50 }
  0xe1   :  { %284 = vmatmul.bf16.gmra.mxu1 %v190_v52 }
  0xe2   :  { %549 = vmatpush.bf16.msra.mxu3 %v1317_v46 }
 0x12e   :  { %v270_v57 = vpop.f32.mrf.mxu1 }
 0x12f   :  { %v271_v59 = vadd.f32 %v1386_v58, %v270_v57 }
 0x131   :  { %v290_v62 = vmax.f32 %v271_v59, 0.0  ;;  %v51_v59 = vunpack.c.h.bf16 %v42_v53 }
 0x136   :  { %v272_v60 = vpop.f32.mrf.mxu1 }
 0x137   :  { %v273_v61 = vadd.f32 %v1386_v58, %v272_v60  ;;  %v418_v60 = vand.u32 127, %v417_v54 }
 0x139   :  { %v291_v63 = vmax.f32 %v273_v61, 0.0  ;;  %vm419_vm0 = vcmp.lt.s32.totalorder %v418_v60, 8 }
 0x13a   :  { %vm1538_vm1 = vmpackc.low %vm419_vm0, %vm419_vm0 }
 0x13b   :  { %v298_v0 = vpack.c.bf16 %v291_v63, %v290_v62 }
 0x13d   :  { %380 = vmatmul.bf16.vlgmr.msra.gmra.mxu2 %v298_v0 }
 0x13e   :  { %v275_v1 = vpop.f32.mrf.mxu1 }
 0x13f   :  { %v276_v2 = vadd.f32 %v1386_v58, %v275_v1 }
 0x141   :  { %v292_v5 = vmax.f32 %v276_v2, 0.0 }
 0x146   :  { %v277_v3 = vpop.f32.mrf.mxu1 }
 0x147   :  { %v278_v4 = vadd.f32 %v1386_v58, %v277_v3 }
 0x149   :  { %v293_v6 = vmax.f32 %v278_v4, 0.0 }
 0x14b   :  { %v299_v7 = vpack.c.bf16 %v293_v6, %v292_v5  ;;  %v1325_v5 = vld [vmem:[%s1732_s2 + $0x4] sm:$0xf] }
 0x14d   :  { %385 = vmatmul.bf16.gmra.mxu2 %v299_v7 }
 0x14e   :  { %v280_v8 = vpop.f32.mrf.mxu1 }
 0x14f   :  { %v281_v9 = vadd.f32 %v1386_v58, %v280_v8 }
 0x151   :  { %v294_v12 = vmax.f32 %v281_v9, 0.0  ;;  %v44_v9 = vld [vmem:[%s1730_s0 + $0x8] sm:$0xff]  }
 0x156   :  { %v282_v10 = vpop.f32.mrf.mxu1 }
 0x157   :  { %v283_v11 = vadd.f32 %v1386_v58, %v282_v10 }
 0x159   :  { %v295_v13 = vmax.f32 %v283_v11, 0.0  ;;  %v52_v11 = vunpack.c.l.bf16 %v44_v9 }
 0x15b   :  { %v300_v14 = vpack.c.bf16 %v295_v13, %v294_v12 }
 0x15d   :  { %390 = vmatmul.bf16.gmra.mxu2 %v300_v14  ;;  %v53_v14 = vunpack.c.h.bf16 %v44_v9 }
 0x15e   :  { %v285_v15 = vpop.f32.mrf.mxu1 }
 0x15f   :  { %v286_v16 = vadd.f32 %v1386_v58, %v285_v15 }
 0x161   :  { %v296_v19 = vmax.f32 %v286_v16, 0.0 }
 0x166   :  { %v287_v17 = vpop.f32.mrf.mxu1 }
 0x167   :  { %v288_v18 = vadd.f32 %v1386_v58, %v287_v17 }
 0x169   :  { %v297_v20 = vmax.f32 %v288_v18, 0.0 }
 0x16b   :  { %v301_v21 = vpack.c.bf16 %v297_v20, %v296_v19 }
 0x16d   :  { %395 = vmatmul.bf16.gmra.mxu2 %v301_v21 }
 0x1c0   :  { %v381_v23 = vpop.f32.mrf.mxu2 }
 0x1c1   :  { %v1501_v24 = vadd.f32 %v1387_v22, %v381_v23 }
 0x1c3   :  { %401 = vrot.lane.b32.xlu0 %v1501_v24, %s1435_s21 }
 0x1c8   :  { %v383_v25 = vpop.f32.mrf.mxu2 }
 0x1c9   :  { %v1504_v26 = vadd.f32 %v1387_v22, %v383_v25  ;;  %v1219_v25 = vld [vmem:[%s1732_s2 + $0x70] sm:$0xf] }
 0x1cb   :  { %403 = vrot.lane.b32.xlu0 %v1504_v26, %s1435_s21 }
 0x1d0   :  { %v386_v27 = vpop.f32.mrf.mxu2 }
 0x1d1   :  { %v1507_v28 = vadd.f32 %v1387_v22, %v386_v27  ;;  %v1339_v27 = vld [vmem:[%s1732_s2 + $0x74] sm:$0xf] }
 0x1d3   :  { %405 = vrot.lane.b32.xlu1 %v1507_v28, %s1435_s21 }
 0x1d8   :  { %v388_v29 = vpop.f32.mrf.mxu2 }
 0x1d9   :  { %v1510_v30 = vadd.f32 %v1387_v22, %v388_v29  ;;  %v1221_v29 = vld [vmem:[%s1732_s2 + $0x78] sm:$0xf0] }
 0x1da   :  { %v1224_v35 = vor.u32 %v1339_v27, %v1221_v29  ;;  %v1173_v29 = vld [vmem:[%s1732_s2 + $0x18] sm:$0xf0] }
 0x1db   :  { %407 = vrot.lane.b32.xlu1 %v1510_v30, %s1435_s21 }
 0x1dc   :  { %714 = vmatpush.bf16.msrb.mxu1 %v1224_v35 }
 0x1e0   :  { %v391_v31 = vpop.f32.mrf.mxu2 }
 0x1e1   :  { %v1513_v32 = vadd.f32 %v1387_v22, %v391_v31  ;;  %v1338_v31 = vld [vmem:[%s1732_s2 + $0x64] sm:$0xf0] }
 0x1e3   :  { %409 = vrot.lane.b32.xlu2 %v1513_v32, %s1435_s21 }
 0x1e8   :  { %v393_v33 = vpop.f32.mrf.mxu2 }
 0x1e9   :  { %v1516_v34 = vadd.f32 %v1387_v22, %v393_v33 }
 0x1eb   :  { %411 = vrot.lane.b32.xlu2 %v1516_v34, %s1435_s21 }
 0x1f0   :  { %v396_v37 = vpop.f32.mrf.mxu2 }
 0x1f1   :  { %v1519_v38 = vadd.f32 %v1387_v22, %v396_v37  ;;  %v1213_v37 = vld [vmem:[%s1732_s2 + $0x68] sm:$0xf0] }
 0x1f2   :  { %v1216_v43 = vor.u32 %v1337_v36, %v1213_v37  ;;  %v1388_v37 = vld [vmem:[%s1734_s4 + $0x3] ss:$0 sm:$0xff] }
 0x1f3   :  { %957 = vrot.lane.b32.xlu2 %v1501_v24, %s1436_s22  ;;  %413 = vrot.lane.b32.xlu0 %v1519_v38, %s1435_s21 }
 0x1f4   :  { %715 = vmatpush.bf16.msrb.mxu1 %v1216_v43 }
 0x1f8   :  { %v398_v39 = vpop.f32.mrf.mxu2 }
 0x1f9   :  { %v1523_v40 = vadd.f32 %v1387_v22, %v398_v39 }
 0x1fb   :  { %415 = vrot.lane.b32.xlu1 %v1523_v40, %s1435_s21  ;;  %963 = vrot.lane.b32.xlu2 %v1510_v30, %s1436_s22 }
 0x1fc   :  { %959 = vrot.lane.b32.xlu0 %v1504_v26, %s1436_s22 }
 0x203   :  { %961 = vrot.lane.b32.xlu1 %v1507_v28, %s1436_s22  ;;  %969 = vrot.lane.b32.xlu2 %v1519_v38, %s1436_s22 }
 0x204   :  { %965 = vrot.lane.b32.xlu0 %v1513_v32, %s1436_s22 }
 0x20b   :  { %967 = vrot.lane.b32.xlu1 %v1516_v34, %s1436_s22 }
 0x20c   :  { %971 = vrot.lane.b32.xlu0 %v1523_v40, %s1436_s22 }
 0x235   :  { %v402_v47 = vpop.permute.xlu0 %401 }
 0x236   :  { %v420_v48 = vmul.f32 0.5, %v402_v47 }
 0x238   :  { %v428_v49 = vmul.f32 1.442695, %v420_v48  ;;  %v1335_v48 = vld [vmem:[%s1732_s2 + $0x54] sm:$0xf] }
 0x23a   :  { %1390 = vpow2.f32 %v428_v49  ;;  %v1205_v49 = vld [vmem:[%s1732_s2 + $0x58] sm:$0xf0] }
 0x23b   :  { %v1208_v54 = vor.u32 %v1335_v48, %v1205_v49 }
 0x23d   :  { %v404_v50 = vpop.permute.xlu0 %403  ;;  %v410_v61 = vpop.permute.xlu2 %409  ;;  %716 = vmatpush.bf16.msrb.mxu1 %v1208_v54  ;;  %v1356_v54 = vld [vmem:[%s1733_s3 + $0x78] sm:$0xff] }
 0x23e   :  { %v421_v51 = vmul.f32 0.5, %v404_v50  ;;  %v424_v15 = vmul.f32 0.5, %v410_v61  ;;  %928 = vmatpush.bf16.msrb.mxu3 %v1356_v54 }
 0x240   :  { %v430_v52 = vmul.f32 1.442695, %v421_v51  ;;  %v1391_v56 = vpop.eup %1390  ;;  %v436_v20 = vmul.f32 1.442695, %v424_v15 }
 0x241   :  { %v444_v62 = vmul.f32 %v1391_v56, %v50_v55  ;;  %v1195_v55 = vld [vmem:[%s1732_s2 + $0x40] sm:$0xf]  ;;  %v1334_v56 = vld [vmem:[%s1732_s2 + $0x44] sm:$0xf0] }
 0x242   :  { %1392 = vpow2.f32 %v430_v52  ;;  %v1204_v52 = vor.u32 %v1336_v45, %v1203_v44  ;;  %v1196_v61 = vor.u32 %v1334_v56, %v1195_v55  ;;  %v1347_v56 = vld [vmem:[%s1733_s3 + $0x30] sm:$0xff] }
 0x243   :  { %v452_v2 = vadd.f32 %v444_v62, %v1501_v24  ;;  %v46_v24 = vld [vmem:[%s1730_s0 + $0x10] sm:$0xff]  }
 0x244   :  { %v55_v33 = vunpack.c.h.bf16 %v46_v24  ;;  %v54_v42 = vunpack.c.l.bf16 %v46_v24 }
 0x245   :  { %v406_v57 = vpop.permute.xlu1 %405  ;;  %v412_v10 = vpop.permute.xlu2 %411 }
 0x246   :  { %v422_v58 = vmul.f32 0.5, %v406_v57  ;;  %v425_v13 = vmul.f32 0.5, %v412_v10  ;;  %v1333_v57 = vld [vmem:[%s1732_s2 + $0x44] sm:$0xf]  ;;  %v1179_v10 = vld [vmem:[%s1732_s2 + $0x20] sm:$0xf] }
 0x248   :  { %v1393_v63 = vpop.eup %1392  ;;  %v432_v0 = vmul.f32 1.442695, %v422_v58  ;;  %v438_v18 = vmul.f32 1.442695, %v425_v13  ;;  %v1197_v58 = vld [vmem:[%s1732_s2 + $0x48] sm:$0xf0] }
 0x249   :  { %v445_v1 = vmul.f32 %v1393_v63, %v51_v59  ;;  %v1200_v63 = vor.u32 %v1333_v57, %v1197_v58  ;;  %v1181_v13 = vld [vmem:[%s1732_s2 + $0x28] sm:$0xf0]  ;;  %v1355_v57 = vld [vmem:[%s1733_s3 + $0x70] sm:$0xff] }
 0x24a   :  { %1394 = vpow2.f32 %v432_v0  ;;  %v1187_v0 = vld [vmem:[%s1732_s2 + $0x30] sm:$0xf]  ;;  %929 = vmatpush.bf16.msrb.mxu3 %v1355_v57  ;;  %v1346_v58 = vld [vmem:[%s1733_s3 + $0x28] sm:$0xff] }
 0x24b   :  { %v453_v3 = vadd.f32 %v445_v1, %v1504_v26  ;;  %v1340_v26 = vld [vmem:[%s1732_s2 + $0x74] sm:$0xf0]  ;;  %717 = vmatpush.bf16.msrb.mxu1 %v1200_v63  ;;  %v1345_v63 = vld [vmem:[%s1733_s3 + $0x20] sm:$0xff] }
 0x24c   :  { %v1332_v1 = vld [vmem:[%s1732_s2 + $0x34] sm:$0xf0] }
 0x24d   :  { %v408_v4 = vpop.permute.xlu1 %407  ;;  %v1150_v7 = vpack.c.bf16 %v453_v3, %v452_v2  ;;  %v1331_v3 = vld [vmem:[%s1732_s2 + $0x34] sm:$0xf] }
 0x24e   :  { %v423_v6 = vmul.f32 0.5, %v408_v4 }
 0x24f   :  { %1151 = vmatmul.msk.bf16.vlgmr.msra.gmra.mxu3 %vm1538_vm1, %v1150_v7  ;;  %v1188_v7 = vor.u32 %v1332_v1, %v1187_v0  ;;  %v1353_v0 = vld [vmem:[%s1733_s3 + $0x60] sm:$0xff] }
 0x250   :  { %v434_v8 = vmul.f32 1.442695, %v423_v6  ;;  %v1395_v12 = vpop.eup %1394  ;;  %v48_v6 = vld [vmem:[%s1730_s0 + $0x18] sm:$0xff]  }
 0x251   :  { %v446_v16 = vmul.f32 %v1395_v12, %v52_v11  ;;  %v1330_v11 = vld [vmem:[%s1732_s2 + $0x24] sm:$0xf0]  ;;  %v1329_v12 = vld [vmem:[%s1732_s2 + $0x24] sm:$0xf] }
 0x252   :  { %1396 = vpow2.f32 %v434_v8  ;;  %v1180_v15 = vor.u32 %v1330_v11, %v1179_v10 }
 0x253   :  { %v454_v21 = vadd.f32 %v446_v16, %v1507_v28  ;;  %1398 = vpow2.f32 %v438_v18  ;;  %v1220_v28 = vor.u32 %v1340_v26, %v1219_v25  ;;  %v1171_v18 = vld [vmem:[%s1732_s2 + $0x10] sm:$0xf] }
 0x254   :  { %1400 = vpow2.f32 %v436_v20  ;;  %v57_v20 = vunpack.c.h.bf16 %v48_v6 }
 0x255   :  { %685 = vmatpush.bf16.msrb.mxu0 %v1220_v28  ;;  %v1327_v28 = vld [vmem:[%s1732_s2 + $0x14] sm:$0xf] }
 0x258   :  { %v1397_v17 = vpop.eup %1396 }
 0x259   :  { %v447_v19 = vmul.f32 %v1397_v17, %v53_v14  ;;  %v1399_v39 = vpop.eup %1398  ;;  %v56_v14 = vunpack.c.l.bf16 %v48_v6  ;;  %v1184_v17 = vor.u32 %v1329_v12, %v1181_v13  ;;  %v1343_v6 = vld [vmem:[%s1733_s3 + $0x10] sm:$0xff] }
 0x25a   :  { %v1401_v46 = vpop.eup %1400  ;;  %v449_v51 = vmul.f32 %v1399_v39, %v55_v33  ;;  %v1165_v33 = vld [vmem:[%s1732_s2 + $0x8] sm:$0xf0] }
 0x25b   :  { %v455_v22 = vadd.f32 %v447_v19, %v1510_v30  ;;  %v1211_v30 = vld [vmem:[%s1732_s2 + $0x60] sm:$0xf]  ;;  %v448_v53 = vmul.f32 %v1401_v46, %v54_v42  ;;  %v1328_v19 = vld [vmem:[%s1732_s2 + $0x14] sm:$0xf0]  ;;  %v1168_v35 = vor.u32 %v1325_v5, %v1165_v33 }
 0x25c   :  { %v1212_v41 = vor.u32 %v1338_v31, %v1211_v30  ;;  %v457_v60 = vadd.f32 %v449_v51, %v1516_v34  ;;  %v1189_v34 = vld [vmem:[%s1732_s2 + $0x38] sm:$0xf0]  ;;  %v1163_v30 = vld [vmem:[%s1732_s2] sm:$0xf] }
 0x25d   :  { %v1153_v23 = vpack.c.bf16 %v455_v22, %v454_v21  ;;  %v456_v62 = vadd.f32 %v448_v53, %v1513_v32  ;;  %v1192_v9 = vor.u32 %v1331_v3, %v1189_v34  ;;  %v1172_v22 = vor.u32 %v1328_v19, %v1171_v18  ;;  %v1348_v53 = vld [vmem:[%s1733_s3 + $0x38] sm:$0xff]  ;;  %v599_v18 = vld [vmem:[%s1735_s5] sm:$0x3] }
 0x25e   :  { %686 = vmatpush.bf16.msrb.mxu0 %v1212_v41  ;;  %899 = vmatpush.bf16.msrb.mxu2 %v1348_v53  ;;  %v1344_v34 = vld [vmem:[%s1733_s3 + $0x18] sm:$0xff] }
 0x25f   :  { %1154 = vmatmul.msk.bf16.gmra.mxu3 %vm1538_vm1, %v1153_v23  ;;  %v1156_v4 = vpack.c.bf16 %v457_v60, %v456_v62  ;;  %718 = vmatpush.bf16.msrb.mxu1 %v1192_v9 }
 0x262   :  { %687 = vmatpush.bf16.msrb.mxu0 %v1204_v52  ;;  %900 = vmatpush.bf16.msrb.mxu2 %v1347_v56 }
 0x263   :  { %719 = vmatpush.bf16.msrb.mxu1 %v1184_v17  ;;  %v1349_v17 = vld [vmem:[%s1733_s3 + $0x40] sm:$0xff] }
 0x265   :  { %v414_v47 = vpop.permute.xlu0 %413 }
 0x266   :  { %v426_v50 = vmul.f32 0.5, %v414_v47  ;;  %688 = vmatpush.bf16.msrb.mxu0 %v1196_v61  ;;  %901 = vmatpush.bf16.msrb.mxu2 %v1346_v58 }
 0x268   :  { %v440_v59 = vmul.f32 1.442695, %v426_v50 }
 0x26a   :  { %1402 = vpow2.f32 %v440_v59  ;;  %689 = vmatpush.bf16.msrb.mxu0 %v1188_v7  ;;  %v1354_v59 = vld [vmem:[%s1733_s3 + $0x68] sm:$0xff]  ;;  %902 = vmatpush.bf16.msrb.mxu2 %v1345_v63  ;;  %v1351_v7 = vld [vmem:[%s1733_s3 + $0x50] sm:$0xff] }
 0x26b   :  { %930 = vmatpush.bf16.msrb.mxu3 %v1354_v59 }
 0x26d   :  { %v416_v2 = vpop.permute.xlu1 %415 }
 0x26e   :  { %v427_v32 = vmul.f32 0.5, %v416_v2  ;;  %690 = vmatpush.bf16.msrb.mxu0 %v1180_v15  ;;  %903 = vmatpush.bf16.msrb.mxu2 %v1344_v34  ;;  %v1350_v15 = vld [vmem:[%s1733_s3 + $0x48] sm:$0xff] }
 0x26f   :  { %1157 = vmatmul.msk.bf16.gmra.mxu3 %vm1538_vm1, %v1156_v4 }
 0x270   :  { %v442_v8 = vmul.f32 1.442695, %v427_v32  ;;  %v1403_v16 = vpop.eup %1402  ;;  %931 = vmatpush.bf16.msrb.mxu3 %v1353_v0  ;;  %v1352_v32 = vld [vmem:[%s1733_s3 + $0x58] sm:$0xff] }
 0x271   :  { %v450_v21 = vmul.f32 %v1403_v16, %v56_v14  ;;  %v1341_v16 = vld [vmem:[%s1733_s3] sm:$0xff] }
 0x272   :  { %1404 = vpow2.f32 %v442_v8  ;;  %691 = vmatpush.bf16.msrb.mxu0 %v1172_v22  ;;  %904 = vmatpush.bf16.msrb.mxu2 %v1343_v6  ;;  %v1342_v8 = vld [vmem:[%s1733_s3 + $0x8] sm:$0xff]  ;;  %v602_v22 = vperm.slane %v599_v18, 1 }
 0x273   :  { %v458_v25 = vadd.f32 %v450_v21, %v1519_v38  ;;  %v1176_v38 = vor.u32 %v1327_v28, %v1173_v29  ;;  %v601_v21 = vperm.slane %v599_v18, 0 }
 0x274   :  { %932 = vmatpush.bf16.msrb.mxu3 %v1352_v32 }
 0x275   :  { %720 = vmatpush.bf16.msrb.mxu1 %v1176_v38 }
 0x276   :  { %905 = vmatpush.bf16.msrb.mxu2 %v1342_v8 }
 0x278   :  { %v1405_v23 = vpop.eup %1404  ;;  %933 = vmatpush.bf16.msrb.mxu3 %v1351_v7 }
 0x279   :  { %v451_v24 = vmul.f32 %v1405_v23, %v57_v20  ;;  %721 = vmatpush.bf16.msrb.mxu1 %v1168_v35 }
 0x27a   :  { %906 = vmatpush.bf16.msrb.mxu2 %v1341_v16 }
 0x27b   :  { %v459_v26 = vadd.f32 %v451_v24, %v1523_v40  ;;  %v1326_v40 = vld [vmem:[%s1732_s2 + $0x4] sm:$0xf0] }
 0x27c   :  { %v1164_v31 = vor.u32 %v1326_v40, %v1163_v30  ;;  %934 = vmatpush.bf16.msrb.mxu3 %v1350_v15  ;;  %v1389_v15 = vld [vmem:[%s1736_s6] ss:$0 sm:$0xff] }
 0x27d   :  { %v1159_v27 = vpack.c.bf16 %v459_v26, %v458_v25 }
 0x27e   :  { %692 = vmatpush.bf16.msrb.mxu0 %v1164_v31 }
 0x27f   :  { %1160 = vmatmul.msk.bf16.gmra.mxu3 %vm1538_vm1, %v1159_v27 }
 0x280   :  { %935 = vmatpush.bf16.msrb.mxu3 %v1349_v17 }
 0x2d2   :  { %v551_v36 = vpop.f32.mrf.mxu3 }
 0x2d3   :  { %v552_v39 = vadd.f32 %v1388_v37, %v551_v36 }
 0x2d5   :  { %v571_v43 = vmax.f32 %v552_v39, 0.0 }
 0x2da   :  { %v553_v41 = vpop.f32.mrf.mxu3 }
 0x2db   :  { %v554_v42 = vadd.f32 %v1388_v37, %v553_v41 }
 0x2dd   :  { %v572_v44 = vmax.f32 %v554_v42, 0.0 }
 0x2df   :  { %v579_v45 = vpack.c.bf16 %v572_v44, %v571_v43 }
 0x2e1   :  { %693 = vmatmul.bf16.vlgmr.msrb.gmra.mxu0 %v579_v45  ;;  %722 = vmatmul.bf16.vlgmr.msrb.gmra.mxu1 %v579_v45 }
 0x2e2   :  { %v556_v46 = vpop.f32.mrf.mxu3 }
 0x2e3   :  { %v557_v47 = vadd.f32 %v1388_v37, %v556_v46 }
 0x2e5   :  { %v573_v50 = vmax.f32 %v557_v47, 0.0 }
 0x2ea   :  { %v558_v48 = vpop.f32.mrf.mxu3 }
 0x2eb   :  { %v559_v49 = vadd.f32 %v1388_v37, %v558_v48 }
 0x2ed   :  { %v574_v51 = vmax.f32 %v559_v49, 0.0 }
 0x2ef   :  { %v580_v52 = vpack.c.bf16 %v574_v51, %v573_v50 }
 0x2f1   :  { %698 = vmatmul.bf16.gmra.mxu0 %v580_v52  ;;  %727 = vmatmul.bf16.gmra.mxu1 %v580_v52 }
 0x2f2   :  { %v561_v55 = vpop.f32.mrf.mxu3 }
 0x2f3   :  { %v562_v60 = vadd.f32 %v1388_v37, %v561_v55 }
 0x2f5   :  { %v575_v1 = vmax.f32 %v562_v60, 0.0 }
 0x2fa   :  { %v563_v61 = vpop.f32.mrf.mxu3 }
 0x2fb   :  { %v564_v62 = vadd.f32 %v1388_v37, %v563_v61 }
 0x2fd   :  { %v576_v2 = vmax.f32 %v564_v62, 0.0 }
 0x2ff   :  { %v581_v3 = vpack.c.bf16 %v576_v2, %v575_v1 }
 0x301   :  { %703 = vmatmul.bf16.gmra.mxu0 %v581_v3  ;;  %732 = vmatmul.bf16.gmra.mxu1 %v581_v3 }
 0x302   :  { %v566_v4 = vpop.f32.mrf.mxu3 }
 0x303   :  { %v567_v9 = vadd.f32 %v1388_v37, %v566_v4 }
 0x305   :  { %v577_v12 = vmax.f32 %v567_v9, 0.0 }
 0x30a   :  { %v568_v10 = vpop.f32.mrf.mxu3 }
 0x30b   :  { %v569_v11 = vadd.f32 %v1388_v37, %v568_v10 }
 0x30d   :  { %v578_v13 = vmax.f32 %v569_v11, 0.0 }
 0x30f   :  { %v582_v14 = vpack.c.bf16 %v578_v13, %v577_v12 }
 0x311   :  { %708 = vmatmul.bf16.gmra.mxu0 %v582_v14  ;;  %737 = vmatmul.bf16.gmra.mxu1 %v582_v14 }
 0x35e   :  { %v694_v19 = vpop.f32.mrf.mxu0  ;;  %v723_v20 = vpop.f32.mrf.mxu1 }
 0x35f   :  { %v695_v23 = vadd.f32 %v694_v19, %v601_v21  ;;  %v724_v24 = vadd.f32 %v723_v20, %v602_v22 }
 0x361   :  { %v743_v29 = vmax.f32 %v695_v23, 0.0  ;;  %v744_v30 = vmax.f32 %v724_v24, 0.0  ;;  %v960_v23 = vpop.permute.xlu0 %959 }
 0x366   :  { %v696_v25 = vpop.f32.mrf.mxu0  ;;  %v725_v26 = vpop.f32.mrf.mxu1 }
 0x367   :  { %v697_v27 = vadd.f32 %v696_v25, %v601_v21  ;;  %v726_v28 = vadd.f32 %v725_v26, %v602_v22 }
 0x369   :  { %v745_v38 = vmax.f32 %v697_v27, 0.0  ;;  %v746_v40 = vmax.f32 %v726_v28, 0.0 }
 0x36b   :  { %v759_v31 = vpack.c.bf16 %v745_v38, %v743_v29  ;;  %v760_v5 = vpack.c.bf16 %v746_v40, %v744_v30 }
 0x36d   :  { %907 = vmatmul.bf16.vlgmr.msrb.gmra.mxu2 %v759_v31  ;;  %936 = vmatmul.bf16.vlgmr.msrb.gmra.mxu3 %v760_v5 }
 0x36e   :  { %v699_v33 = vpop.f32.mrf.mxu0  ;;  %v728_v35 = vpop.f32.mrf.mxu1 }
 0x36f   :  { %v700_v36 = vadd.f32 %v699_v33, %v601_v21  ;;  %v729_v37 = vadd.f32 %v728_v35, %v602_v22  ;;  %v962_v35 = vpop.permute.xlu1 %961 }
 0x371   :  { %v747_v44 = vmax.f32 %v700_v36, 0.0  ;;  %v748_v45 = vmax.f32 %v729_v37, 0.0 }
 0x376   :  { %v701_v39 = vpop.f32.mrf.mxu0  ;;  %v730_v41 = vpop.f32.mrf.mxu1 }
 0x377   :  { %v702_v42 = vadd.f32 %v701_v39, %v601_v21  ;;  %v731_v43 = vadd.f32 %v730_v41, %v602_v22 }
 0x379   :  { %v749_v46 = vmax.f32 %v702_v42, 0.0  ;;  %v750_v47 = vmax.f32 %v731_v43, 0.0 }
 0x37b   :  { %v761_v48 = vpack.c.bf16 %v749_v46, %v747_v44  ;;  %v762_v49 = vpack.c.bf16 %v750_v47, %v748_v45 }
 0x37d   :  { %912 = vmatmul.bf16.gmra.mxu2 %v761_v48  ;;  %941 = vmatmul.bf16.gmra.mxu3 %v762_v49  ;;  %v966_v49 = vpop.permute.xlu0 %965 }
 0x37e   :  { %v704_v50 = vpop.f32.mrf.mxu0  ;;  %v733_v51 = vpop.f32.mrf.mxu1 }
 0x37f   :  { %v705_v52 = vadd.f32 %v704_v50, %v601_v21  ;;  %v734_v53 = vadd.f32 %v733_v51, %v602_v22  ;;  %v968_v50 = vpop.permute.xlu1 %967 }
 0x381   :  { %v751_v58 = vmax.f32 %v705_v52, 0.0  ;;  %v752_v59 = vmax.f32 %v734_v53, 0.0 }
 0x386   :  { %v706_v54 = vpop.f32.mrf.mxu0  ;;  %v735_v55 = vpop.f32.mrf.mxu1 }
 0x387   :  { %v707_v56 = vadd.f32 %v706_v54, %v601_v21  ;;  %v736_v57 = vadd.f32 %v735_v55, %v602_v22 }
 0x389   :  { %v753_v60 = vmax.f32 %v707_v56, 0.0  ;;  %v754_v61 = vmax.f32 %v736_v57, 0.0 }
 0x38b   :  { %v763_v62 = vpack.c.bf16 %v753_v60, %v751_v58  ;;  %v764_v63 = vpack.c.bf16 %v754_v61, %v752_v59 }
 0x38d   :  { %917 = vmatmul.bf16.gmra.mxu2 %v763_v62  ;;  %946 = vmatmul.bf16.gmra.mxu3 %v764_v63  ;;  %v972_v63 = vpop.permute.xlu0 %971 }
 0x38e   :  { %v709_v0 = vpop.f32.mrf.mxu0  ;;  %v738_v1 = vpop.f32.mrf.mxu1 }
 0x38f   :  { %v710_v2 = vadd.f32 %v709_v0, %v601_v21  ;;  %v739_v3 = vadd.f32 %v738_v1, %v602_v22 }
 0x391   :  { %v755_v7 = vmax.f32 %v710_v2, 0.0  ;;  %v756_v8 = vmax.f32 %v739_v3, 0.0 }
 0x396   :  { %v711_v34 = vpop.f32.mrf.mxu0  ;;  %v740_v32 = vpop.f32.mrf.mxu1 }
 0x397   :  { %v712_v4 = vadd.f32 %v711_v34, %v601_v21  ;;  %v741_v6 = vadd.f32 %v740_v32, %v602_v22  ;;  %v958_v22 = vpop.permute.xlu2 %957 }
 0x399   :  { %v757_v9 = vmax.f32 %v712_v4, 0.0  ;;  %v758_v10 = vmax.f32 %v741_v6, 0.0 }
 0x39b   :  { %v765_v11 = vpack.c.bf16 %v757_v9, %v755_v7  ;;  %v766_v12 = vpack.c.bf16 %v758_v10, %v756_v8 }
 0x39d   :  { %922 = vmatmul.bf16.gmra.mxu2 %v765_v11  ;;  %951 = vmatmul.bf16.gmra.mxu3 %v766_v12 }
 0x39f   :  { %v964_v33 = vpop.permute.xlu2 %963 }
 0x3a7   :  { %v970_v62 = vpop.permute.xlu2 %969 }
 0x3f0   :  { %v908_v13 = vpop.f32.mrf.mxu2  ;;  %v937_v14 = vpop.f32.mrf.mxu3 }
 0x3f1   :  { %v909_v16 = vadd.f32 %v1389_v15, %v908_v13 }
 0x3f3   :  { %v938_v19 = vadd.f32 %v937_v14, %v909_v16 }
 0x3f5   :  { %v973_v24 = vadd.f32 %v958_v22, %v938_v19 }
 0x3f8   :  { %v910_v17 = vpop.f32.mrf.mxu2  ;;  %v939_v18 = vpop.f32.mrf.mxu3 }
 0x3f9   :  { %v911_v20 = vadd.f32 %v1389_v15, %v910_v17 }
 0x3fb   :  { %v940_v21 = vadd.f32 %v939_v18, %v911_v20 }
 0x3fd   :  { %v974_v25 = vadd.f32 %v960_v23, %v940_v21 }
 0x3ff   :  { %v1360_v26 = vpack.c.bf16 %v974_v25, %v973_v24 }
 0x400   :  { %v913_v27 = vpop.f32.mrf.mxu2  ;;  %v942_v28 = vpop.f32.mrf.mxu3 }
 0x401   :  { %1361 = vst [vmem:[%s1737_s7] sm:$0xff] %v1360_v26   ;;  %v914_v29 = vadd.f32 %v1389_v15, %v913_v27 }
 0x403   :  { %v943_v40 = vadd.f32 %v942_v28, %v914_v29 }
 0x405   :  { %v975_v36 = vadd.f32 %v962_v35, %v943_v40 }
 0x408   :  { %v915_v30 = vpop.f32.mrf.mxu2  ;;  %v944_v38 = vpop.f32.mrf.mxu3 }
 0x409   :  { %v916_v31 = vadd.f32 %v1389_v15, %v915_v30 }
 0x40b   :  { %v945_v5 = vadd.f32 %v944_v38, %v916_v31 }
 0x40d   :  { %v976_v37 = vadd.f32 %v964_v33, %v945_v5 }
 0x40f   :  { %v1365_v39 = vpack.c.bf16 %v976_v37, %v975_v36 }
 0x410   :  { %v918_v41 = vpop.f32.mrf.mxu2  ;;  %v947_v42 = vpop.f32.mrf.mxu3 }
 0x411   :  { %1377 = vst [vmem:[%s1737_s7 + $0x8] sm:$0xff] %v1365_v39   ;;  %v919_v43 = vadd.f32 %v1389_v15, %v918_v41 }
 0x413   :  { %v948_v46 = vadd.f32 %v947_v42, %v919_v43 }
 0x415   :  { %v977_v51 = vadd.f32 %v966_v49, %v948_v46 }
 0x418   :  { %v920_v44 = vpop.f32.mrf.mxu2  ;;  %v949_v45 = vpop.f32.mrf.mxu3 }
 0x419   :  { %v921_v47 = vadd.f32 %v1389_v15, %v920_v44 }
 0x41b   :  { %v950_v48 = vadd.f32 %v949_v45, %v921_v47 }
 0x41d   :  { %v978_v52 = vadd.f32 %v968_v50, %v950_v48 }
 0x41f   :  { %v1370_v53 = vpack.c.bf16 %v978_v52, %v977_v51 }
 0x420   :  { %v923_v54 = vpop.f32.mrf.mxu2  ;;  %v952_v55 = vpop.f32.mrf.mxu3 }
 0x421   :  { %1378 = vst [vmem:[%s1737_s7 + $0x10] sm:$0xff] %v1370_v53   ;;  %v924_v56 = vadd.f32 %v1389_v15, %v923_v54 }
 0x423   :  { %v953_v58 = vadd.f32 %v952_v55, %v924_v56 }
 0x425   :  { %v979_v0 = vadd.f32 %v970_v62, %v953_v58 }
 0x428   :  { %v925_v57 = vpop.f32.mrf.mxu2  ;;  %v954_v60 = vpop.f32.mrf.mxu3 }
 0x429   :  { %v926_v59 = vadd.f32 %v1389_v15, %v925_v57 }
 0x42b   :  { %v955_v61 = vadd.f32 %v954_v60, %v926_v59 }
 0x42d   :  { %v980_v1 = vadd.f32 %v972_v63, %v955_v61 }
 0x42f   :  { %v1375_v2 = vpack.c.bf16 %v980_v1, %v979_v0 }
 0x431   :  { %1379 = vst [vmem:[%s1737_s7 + $0x18] sm:$0xff] %v1375_v2  }
 0x432   :  { %1001 = vsyncpa [#allocation3], 1 }

</bundles_post_ra>
